<compile_context>
chip_gen: v6e
topology: v6e:2x2x1
jax: 0.10.0
libtpu: 0.0.40
codegen_flags: <defaults>
</compile_context>

<pallas_src>
import functools

import jax
import jax.numpy as jnp
from jax.experimental import pallas as pl
from jax.experimental.pallas import tpu as pltpu


def _round_up(x, m):
    return (x + m - 1) // m * m


@functools.lru_cache(maxsize=None)
def _physical_vmem_bytes():
    """Per-core physical VMEM; conservative fallback is v7x's 64 MiB."""
    try:
        return int(pltpu.get_tpu_info().vmem_capacity_bytes)
    except Exception:
        return 64 << 20


@functools.lru_cache(maxsize=None)
def _tanh_in_bf16():
    """bf16 EUP exists on v6e/v7x; v5e and older need the f32 tanh path."""
    try:
        kind = jax.devices()[0].device_kind.lower()
    except Exception:
        return False
    return not any(v in kind for v in ("v2", "v3", "v4", "v5"))


# ----------------------------------------------------------------------------
# Kernel
# ----------------------------------------------------------------------------
def decoder_intent_kernel(hidden_ref, intent_d_ref, domain_d_ref,
                          wW_ref, bW_ref, wV_ref, bV_ref, wF_ref, bF_ref,
                          out_ref, *, tanh_in_bf16):
    """One batch tile: 3 bf16 MXU matmuls (f32 accumulate) + epilogue."""
    # Activations arrive as bf16 (halved HBM traffic / VMEM); upcast only what
    # the f32 epilogue needs.  domain_d feeds the MXU directly.
    intent_d = intent_d_ref[...].astype(jnp.float32)      # (tm, Hp) f32

    # W(domain_d): bf16 x bf16 -> f32
    w_dom = jnp.dot(domain_d_ref[...], wW_ref[...],
                    preferred_element_type=jnp.float32) + bW_ref[...]

    # tanh(intent_d + W(domain_d))
    s = intent_d + w_dom
    if tanh_in_bf16:
        t = jnp.tanh(s.astype(jnp.bfloat16))       # v6e/v7x: bf16 EUP path
    else:
        t = jnp.tanh(s).astype(jnp.bfloat16)       # v5e: f32 EUP only

    # V(t)
    gate = jnp.dot(t, wV_ref[...],
                   preferred_element_type=jnp.float32) + bV_ref[...]

    # output = hidden + intent_d * gate   (f32 VPU epilogue)
    output = hidden_ref[...].astype(jnp.float32) + intent_d * gate

    # intent = fn(output)
    intent = jnp.dot(output.astype(jnp.bfloat16), wF_ref[...],
                     preferred_element_type=jnp.float32) + bF_ref[...]

    out_ref[...] = intent.astype(out_ref.dtype)


# ----------------------------------------------------------------------------
# One-time parameter preparation (transpose + pad + bf16 cast)
# ----------------------------------------------------------------------------
def prepare_params(params, hidden_size, intent_size):
    """torch-style (out, in) f32 weights -> kernel-ready lane-dense buffers.

    Done ONCE outside the per-step path: weights -> (in_pad, out_pad) bf16,
    biases -> (1, out_pad) f32, zero-padded to multiples of 128.
    """
    H_pad = _round_up(hidden_size, 128)
    I_pad = _round_up(intent_size, 128)

    def prep_w(w, in_pad, out_pad):
        wt = jnp.zeros((in_pad, out_pad), jnp.float32)
        wt = wt.at[:w.shape[1], :w.shape[0]].set(w.T)      # (in, out)
        return wt.astype(jnp.bfloat16)

    def prep_b(b, out_pad):
        bb = jnp.zeros((1, out_pad), jnp.float32)
        return bb.at[0, :b.shape[0]].set(b)

    wV, bV = params["V"]
    wW, bW = params["W"]
    wF, bF = params["fn"]

    return (prep_w(wW, H_pad, H_pad), prep_b(bW, H_pad),
            prep_w(wV, H_pad, H_pad), prep_b(bV, H_pad),
            prep_w(wF, H_pad, I_pad), prep_b(bF, I_pad))


# ----------------------------------------------------------------------------
# Wrapper
# ----------------------------------------------------------------------------
@functools.partial(jax.jit, static_argnames=("intent_size", "block_m",
                                             "single_buffer_weights"))
def decoder_intent(hidden, intent_d, domain_d, weights, intent_size,
                   block_m=256, single_buffer_weights=True):
    wW, bW, wV, bV, wF, bF = weights

    B, H = hidden.shape
    H_pad = wW.shape[0]
    I_pad = wF.shape[1]

    # Batch tiling.  Guarantee >= 2 tiles whenever B_pad >= 16 so v7x can
    # shard the "parallel" axis across its 2 TCs and so there is a real
    # software pipeline (DMA / epilogue hidden under the next tile's MXU).
    B_pad8 = _round_up(B, 8)
    if B_pad8 >= 16:
        tm = min(block_m, _round_up(pl.cdiv(B_pad8, 2), 8))
    else:
        tm = B_pad8
    grid_m = pl.cdiv(B_pad8, tm)
    B_pad = grid_m * tm

    # bf16 cast + (only if needed) zero-pad, fused by XLA into a single pass.
    def prep_act(x):
        x = x.astype(jnp.bfloat16)
        if B_pad != B or H_pad != H:
            x = jnp.pad(x, ((0, B_pad - B), (0, H_pad - H)))
        return x

    hidden_p = prep_act(hidden)
    intent_p = prep_act(intent_d)
    domain_p = prep_act(domain_d)

    # VMEM budget: single-buffered weights + double-buffered bf16 activation
    # tiles + double-buffered f32 output tile, headroom, generation-aware cap.
    weight_bytes = (wW.size + wV.size + wF.size) * 2 \
        + (bW.size + bV.size + bF.size) * 4
    n_wbuf = 1 if single_buffer_weights else 2
    act_bytes = 2 * 3 * tm * H_pad * 2
    out_bytes = 2 * tm * I_pad * 4
    vmem_need = n_wbuf * weight_bytes + act_bytes + out_bytes
    phys = _physical_vmem_bytes()
    vmem_limit = max(min(int(vmem_need * 1.25) + (2 << 20), phys - (8 << 20)),
                     16 << 20)

    cost = pl.CostEstimate(
        flops=2 * B_pad * (2 * H_pad * H_pad + H_pad * I_pad),
        transcendentals=B_pad * H_pad,
        bytes_accessed=weight_bytes + 3 * B_pad * H_pad * 2 + B_pad * I_pad * 4,
    )

    act_spec = pl.BlockSpec((tm, H_pad), lambda i: (i, 0))
    # Resident weights: constant index_map -> no DMA to hide, so single-buffer
    # them (halves weight VMEM).
    w_mode = pl.Buffered(1) if single_buffer_weights else None

    def res_spec(shape):
        return pl.BlockSpec(shape, lambda i: (0, 0), pipeline_mode=w_mode)

    out_pad = pl.pallas_call(
        functools.partial(decoder_intent_kernel, tanh_in_bf16=_tanh_in_bf16()),
        out_shape=jax.ShapeDtypeStruct((B_pad, I_pad), jnp.float32),
        grid=(grid_m,),
        in_specs=[
            act_spec, act_spec, act_spec,                 # hidden, intent_d, domain_d
            res_spec((H_pad, H_pad)), res_spec((1, H_pad)),   # W weight / bias
            res_spec((H_pad, H_pad)), res_spec((1, H_pad)),   # V weight / bias
            res_spec((H_pad, I_pad)), res_spec((1, I_pad)),   # fn weight / bias
        ],
        out_specs=pl.BlockSpec((tm, I_pad), lambda i: (i, 0)),
        compiler_params=pltpu.CompilerParams(
            dimension_semantics=("parallel",),
            vmem_limit_bytes=vmem_limit,
        ),
        cost_estimate=cost,
    )(hidden_p, intent_p, domain_p, wW, bW, wV, bV, wF, bF)

    if B_pad != B or I_pad != intent_size:
        out_pad = out_pad[:B, :intent_size]
    return out_pad


# ----------------------------------------------------------------------------
# Synthetic params + pure-JAX reference
# ----------------------------------------------------------------------------
def init_params(key, hidden_size, intent_size):
    """Deterministic synthetic parameters; torch Linear weight shape (out, in)."""
    ks = jax.random.split(key, 6)
    scale = 1.0 / jnp.sqrt(hidden_size)
    return {
        "V": (jax.random.uniform(ks[0], (hidden_size, hidden_size),
                                 jnp.float32, -scale, scale),
              jax.random.uniform(ks[1], (hidden_size,),
                                 jnp.float32, -scale, scale)),
        "W": (jax.random.uniform(ks[2], (hidden_size, hidden_size),
                                 jnp.float32, -scale, scale),
              jax.random.uniform(ks[3], (hidden_size,),
                                 jnp.float32, -scale, scale)),
        "fn": (jax.random.uniform(ks[4], (intent_size, hidden_size),
                                  jnp.float32, -scale, scale),
               jax.random.uniform(ks[5], (intent_size,),
                                  jnp.float32, -scale, scale)),
    }


def reference(hidden, intent_d, domain_d, params):
    """Pure-JAX f32 reference matching the PyTorch forward exactly."""
    wV, bV = params["V"]
    wW, bW = params["W"]
    wF, bF = params["fn"]
    intent_gate = jnp.tanh(intent_d + domain_d @ wW.T + bW) @ wV.T + bV
    intent_gate = intent_d * intent_gate
    output = hidden + intent_gate
    return output @ wF.T + bF


if __name__ == "__main__":
    def run_case(key, batch, hidden_size, intent_size):
        k_h, k_i, k_d, k_p = jax.random.split(key, 4)
        hidden = jax.random.normal(k_h, (batch, hidden_size), jnp.float32)
        intent_d = jax.random.normal(k_i, (batch, hidden_size), jnp.float32)
        domain_d = jax.random.normal(k_d, (batch, hidden_size), jnp.float32)
        params = init_params(k_p, hidden_size, intent_size)
        weights = prepare_params(params, hidden_size, intent_size)  # one-time

        try:
            out = decoder_intent(hidden, intent_d, domain_d, weights,
                                 intent_size)
        except Exception:
            # Fallback if this JAX build rejects single-buffered BlockSpecs.
            out = decoder_intent(hidden, intent_d, domain_d, weights,
                                 intent_size, single_buffer_weights=False)
        out = jax.block_until_ready(out)

        ref = reference(hidden, intent_d, domain_d, params)
        assert out.shape == (batch, intent_size), out.shape
        # bf16 MXU operands / bf16 activation transport with f32 accumulation
        # -> relaxed tolerance vs the f32 reference.
        assert jnp.allclose(out, ref, atol=5e-2, rtol=5e-2), (
            "mismatch vs reference, max abs err = "
            f"{float(jnp.max(jnp.abs(out - ref)))}")

    key = jax.random.PRNGKey(0)
    k1, k2 = jax.random.split(key)
    # Small shape (grid_m == 1).
    run_case(k1, batch=8, hidden_size=32, intent_size=16)
    # grid_m == 2 with non-multiple-of-128 hidden/intent: exercises the
    # index_map, zero-padding and batch-tiling paths.
    run_case(k2, batch=48, hidden_size=160, intent_size=80)

    print("KERNEL_OK")
</pallas_src>

<mosaic_0001>
module attributes {stable_mosaic.version = 11 : i64} {
  func.func @decoder_intent_kernel(%arg0: i32, %arg1: memref<8x128xbf16, #tpu.memory_space<vmem>>, %arg2: memref<8x128xbf16, #tpu.memory_space<vmem>>, %arg3: memref<8x128xbf16, #tpu.memory_space<vmem>>, %arg4: memref<128x128xbf16, #tpu.memory_space<vmem>>, %arg5: memref<1x128xf32, #tpu.memory_space<vmem>>, %arg6: memref<128x128xbf16, #tpu.memory_space<vmem>>, %arg7: memref<1x128xf32, #tpu.memory_space<vmem>>, %arg8: memref<128x128xbf16, #tpu.memory_space<vmem>>, %arg9: memref<1x128xf32, #tpu.memory_space<vmem>>, %arg10: memref<8x128xf32, #tpu.memory_space<vmem>>) attributes {dimension_semantics = [#tpu.dimension_semantics<parallel>], iteration_bounds = array<i64: 1>, scalar_prefetch = 0 : i64, scratch_operands = 0 : i64, tpu.core_type = #tpu.core_type<tc>, window_params = [{transform_indices = @transform_0, window_bounds = array<i64: 8, 128>}, {transform_indices = @transform_1, window_bounds = array<i64: 8, 128>}, {transform_indices = @transform_2, window_bounds = array<i64: 8, 128>}, {pipeline_mode = #tpu.pipeline_mode<synchronous>, transform_indices = @transform_3, window_bounds = array<i64: 128, 128>}, {pipeline_mode = #tpu.pipeline_mode<synchronous>, transform_indices = @transform_4, window_bounds = array<i64: 1, 128>}, {pipeline_mode = #tpu.pipeline_mode<synchronous>, transform_indices = @transform_5, window_bounds = array<i64: 128, 128>}, {pipeline_mode = #tpu.pipeline_mode<synchronous>, transform_indices = @transform_6, window_bounds = array<i64: 1, 128>}, {pipeline_mode = #tpu.pipeline_mode<synchronous>, transform_indices = @transform_7, window_bounds = array<i64: 128, 128>}, {pipeline_mode = #tpu.pipeline_mode<synchronous>, transform_indices = @transform_8, window_bounds = array<i64: 1, 128>}, {transform_indices = @transform_9, window_bounds = array<i64: 8, 128>}]} {
    %c0 = arith.constant 0 : index
    %c0_0 = arith.constant 0 : index
    %0 = vector.load %arg2[%c0, %c0_0] : memref<8x128xbf16, #tpu.memory_space<vmem>>, vector<8x128xbf16>
    %1 = arith.extf %0 : vector<8x128xbf16> to vector<8x128xf32>
    %c0_1 = arith.constant 0 : index
    %c0_2 = arith.constant 0 : index
    %2 = vector.load %arg3[%c0_1, %c0_2] : memref<8x128xbf16, #tpu.memory_space<vmem>>, vector<8x128xbf16>
    %c0_3 = arith.constant 0 : index
    %c0_4 = arith.constant 0 : index
    %3 = vector.load %arg4[%c0_3, %c0_4] : memref<128x128xbf16, #tpu.memory_space<vmem>>, vector<128x128xbf16>
    %cst = arith.constant dense<0.000000e+00> : vector<8x128xf32>
    %4 = tpu.matmul %2, %3, %cst {dimension_numbers = #tpu.dot_dimension_numbers<[1], [0], [0], [1], [0, 0, 1, 1], [], []>} : vector<8x128xbf16>, vector<128x128xbf16>, vector<8x128xf32> -> vector<8x128xf32>
    %c0_5 = arith.constant 0 : index
    %c0_6 = arith.constant 0 : index
    %5 = vector.load %arg5[%c0_5, %c0_6] : memref<1x128xf32, #tpu.memory_space<vmem>>, vector<1x128xf32>
    %6 = vector.broadcast %5 : vector<1x128xf32> to vector<8x128xf32>
    %7 = arith.addf %4, %6 : vector<8x128xf32>
    %8 = arith.addf %1, %7 : vector<8x128xf32>
    %9 = arith.truncf %8 : vector<8x128xf32> to vector<8x128xbf16>
    %10 = math.tanh %9 : vector<8x128xbf16>
    %c0_7 = arith.constant 0 : index
    %c0_8 = arith.constant 0 : index
    %11 = vector.load %arg6[%c0_7, %c0_8] : memref<128x128xbf16, #tpu.memory_space<vmem>>, vector<128x128xbf16>
    %cst_9 = arith.constant dense<0.000000e+00> : vector<8x128xf32>
    %12 = tpu.matmul %10, %11, %cst_9 {dimension_numbers = #tpu.dot_dimension_numbers<[1], [0], [0], [1], [0, 0, 1, 1], [], []>} : vector<8x128xbf16>, vector<128x128xbf16>, vector<8x128xf32> -> vector<8x128xf32>
    %c0_10 = arith.constant 0 : index
    %c0_11 = arith.constant 0 : index
    %13 = vector.load %arg7[%c0_10, %c0_11] : memref<1x128xf32, #tpu.memory_space<vmem>>, vector<1x128xf32>
    %14 = vector.broadcast %13 : vector<1x128xf32> to vector<8x128xf32>
    %15 = arith.addf %12, %14 : vector<8x128xf32>
    %c0_12 = arith.constant 0 : index
    %c0_13 = arith.constant 0 : index
    %16 = vector.load %arg1[%c0_12, %c0_13] : memref<8x128xbf16, #tpu.memory_space<vmem>>, vector<8x128xbf16>
    %17 = arith.extf %16 : vector<8x128xbf16> to vector<8x128xf32>
    %18 = arith.mulf %1, %15 : vector<8x128xf32>
    %19 = arith.addf %17, %18 : vector<8x128xf32>
    %20 = arith.truncf %19 : vector<8x128xf32> to vector<8x128xbf16>
    %c0_14 = arith.constant 0 : index
    %c0_15 = arith.constant 0 : index
    %21 = vector.load %arg8[%c0_14, %c0_15] : memref<128x128xbf16, #tpu.memory_space<vmem>>, vector<128x128xbf16>
    %cst_16 = arith.constant dense<0.000000e+00> : vector<8x128xf32>
    %22 = tpu.matmul %20, %21, %cst_16 {dimension_numbers = #tpu.dot_dimension_numbers<[1], [0], [0], [1], [0, 0, 1, 1], [], []>} : vector<8x128xbf16>, vector<128x128xbf16>, vector<8x128xf32> -> vector<8x128xf32>
    %c0_17 = arith.constant 0 : index
    %c0_18 = arith.constant 0 : index
    %23 = vector.load %arg9[%c0_17, %c0_18] : memref<1x128xf32, #tpu.memory_space<vmem>>, vector<1x128xf32>
    %24 = vector.broadcast %23 : vector<1x128xf32> to vector<8x128xf32>
    %25 = arith.addf %22, %24 : vector<8x128xf32>
    %c0_19 = arith.constant 0 : index
    %c0_20 = arith.constant 0 : index
    %26 = vector.load %arg10[%c0_19, %c0_20] : memref<8x128xf32, #tpu.memory_space<vmem>>, vector<8x128xf32>
    tpu.vector_store %arg10[%c0_19, %c0_20], %25 {strides = array<i32>} : memref<8x128xf32, #tpu.memory_space<vmem>>, vector<8x128xf32>,
    return
  }
  func.func @transform_0(%arg0: i32) -> (i32, i32) {
    %c0_i32 = arith.constant 0 : i32
    %c0_i32_0 = arith.constant 0 : i32
    return %arg0, %c0_i32 : i32, i32
  }
  func.func @transform_1(%arg0: i32) -> (i32, i32) {
    %c0_i32 = arith.constant 0 : i32
    %c0_i32_0 = arith.constant 0 : i32
    return %arg0, %c0_i32 : i32, i32
  }
  func.func @transform_2(%arg0: i32) -> (i32, i32) {
    %c0_i32 = arith.constant 0 : i32
    %c0_i32_0 = arith.constant 0 : i32
    return %arg0, %c0_i32 : i32, i32
  }
  func.func @transform_3(%arg0: i32) -> (i32, i32) {
    %c0_i32 = arith.constant 0 : i32
    %c0_i32_0 = arith.constant 0 : i32
    %c0_i32_1 = arith.constant 0 : i32
    return %c0_i32, %c0_i32_0 : i32, i32
  }
  func.func @transform_4(%arg0: i32) -> (i32, i32) {
    %c0_i32 = arith.constant 0 : i32
    %c0_i32_0 = arith.constant 0 : i32
    %c0_i32_1 = arith.constant 0 : i32
    return %c0_i32, %c0_i32_0 : i32, i32
  }
  func.func @transform_5(%arg0: i32) -> (i32, i32) {
    %c0_i32 = arith.constant 0 : i32
    %c0_i32_0 = arith.constant 0 : i32
    %c0_i32_1 = arith.constant 0 : i32
    return %c0_i32, %c0_i32_0 : i32, i32
  }
  func.func @transform_6(%arg0: i32) -> (i32, i32) {
    %c0_i32 = arith.constant 0 : i32
    %c0_i32_0 = arith.constant 0 : i32
    %c0_i32_1 = arith.constant 0 : i32
    return %c0_i32, %c0_i32_0 : i32, i32
  }
  func.func @transform_7(%arg0: i32) -> (i32, i32) {
    %c0_i32 = arith.constant 0 : i32
    %c0_i32_0 = arith.constant 0 : i32
    %c0_i32_1 = arith.constant 0 : i32
    return %c0_i32, %c0_i32_0 : i32, i32
  }
  func.func @transform_8(%arg0: i32) -> (i32, i32) {
    %c0_i32 = arith.constant 0 : i32
    %c0_i32_0 = arith.constant 0 : i32
    %c0_i32_1 = arith.constant 0 : i32
    return %c0_i32, %c0_i32_0 : i32, i32
  }
  func.func @transform_9(%arg0: i32) -> (i32, i32) {
    %c0_i32 = arith.constant 0 : i32
    %c0_i32_0 = arith.constant 0 : i32
    return %arg0, %c0_i32 : i32, i32
  }
}

module attributes {stable_mosaic.version = 11 : i64} {
  func.func @decoder_intent_kernel(%arg0: i32, %arg1: memref<8x128xbf16, #tpu.memory_space<vmem>>, %arg2: memref<8x128xbf16, #tpu.memory_space<vmem>>, %arg3: memref<8x128xbf16, #tpu.memory_space<vmem>>, %arg4: memref<128x128xbf16, #tpu.memory_space<vmem>>, %arg5: memref<1x128xf32, #tpu.memory_space<vmem>>, %arg6: memref<128x128xbf16, #tpu.memory_space<vmem>>, %arg7: memref<1x128xf32, #tpu.memory_space<vmem>>, %arg8: memref<128x128xbf16, #tpu.memory_space<vmem>>, %arg9: memref<1x128xf32, #tpu.memory_space<vmem>>, %arg10: memref<8x128xf32, #tpu.memory_space<vmem>>) attributes {dimension_semantics = [#tpu.dimension_semantics<parallel>], iteration_bounds = array<i64: 1>, scalar_prefetch = 0 : i64, scratch_operands = 0 : i64, tpu.core_type = #tpu.core_type<tc>, window_params = [{transform_indices = @transform_0, window_bounds = array<i64: 8, 128>}, {transform_indices = @transform_1, window_bounds = array<i64: 8, 128>}, {transform_indices = @transform_2, window_bounds = array<i64: 8, 128>}, {pipeline_mode = #tpu.pipeline_mode<synchronous>, transform_indices = @transform_3, window_bounds = array<i64: 128, 128>}, {pipeline_mode = #tpu.pipeline_mode<synchronous>, transform_indices = @transform_4, window_bounds = array<i64: 1, 128>}, {pipeline_mode = #tpu.pipeline_mode<synchronous>, transform_indices = @transform_5, window_bounds = array<i64: 128, 128>}, {pipeline_mode = #tpu.pipeline_mode<synchronous>, transform_indices = @transform_6, window_bounds = array<i64: 1, 128>}, {pipeline_mode = #tpu.pipeline_mode<synchronous>, transform_indices = @transform_7, window_bounds = array<i64: 128, 128>}, {pipeline_mode = #tpu.pipeline_mode<synchronous>, transform_indices = @transform_8, window_bounds = array<i64: 1, 128>}, {transform_indices = @transform_9, window_bounds = array<i64: 8, 128>}]} {
    %c0 = arith.constant 0 : index
    %c0_0 = arith.constant 0 : index
    %0 = vector.load %arg2[%c0, %c0_0] : memref<8x128xbf16, #tpu.memory_space<vmem>>, vector<8x128xbf16>
    %1 = arith.extf %0 : vector<8x128xbf16> to vector<8x128xf32>
    %c0_1 = arith.constant 0 : index
    %c0_2 = arith.constant 0 : index
    %2 = vector.load %arg3[%c0_1, %c0_2] : memref<8x128xbf16, #tpu.memory_space<vmem>>, vector<8x128xbf16>
    %c0_3 = arith.constant 0 : index
    %c0_4 = arith.constant 0 : index
    %3 = vector.load %arg4[%c0_3, %c0_4] : memref<128x128xbf16, #tpu.memory_space<vmem>>, vector<128x128xbf16>
    %cst = arith.constant dense<0.000000e+00> : vector<8x128xf32>
    %4 = tpu.matmul %2, %3, %cst {dimension_numbers = #tpu.dot_dimension_numbers<[1], [0], [0], [1], [0, 0, 1, 1], [], []>} : vector<8x128xbf16>, vector<128x128xbf16>, vector<8x128xf32> -> vector<8x128xf32>
    %c0_5 = arith.constant 0 : index
    %c0_6 = arith.constant 0 : index
    %5 = vector.load %arg5[%c0_5, %c0_6] : memref<1x128xf32, #tpu.memory_space<vmem>>, vector<1x128xf32>
    %6 = vector.broadcast %5 : vector<1x128xf32> to vector<8x128xf32>
    %7 = arith.addf %4, %6 : vector<8x128xf32>
    %8 = arith.addf %1, %7 : vector<8x128xf32>
    %9 = arith.truncf %8 : vector<8x128xf32> to vector<8x128xbf16>
    %10 = math.tanh %9 : vector<8x128xbf16>
    %c0_7 = arith.constant 0 : index
    %c0_8 = arith.constant 0 : index
    %11 = vector.load %arg6[%c0_7, %c0_8] : memref<128x128xbf16, #tpu.memory_space<vmem>>, vector<128x128xbf16>
    %cst_9 = arith.constant dense<0.000000e+00> : vector<8x128xf32>
    %12 = tpu.matmul %10, %11, %cst_9 {dimension_numbers = #tpu.dot_dimension_numbers<[1], [0], [0], [1], [0, 0, 1, 1], [], []>} : vector<8x128xbf16>, vector<128x128xbf16>, vector<8x128xf32> -> vector<8x128xf32>
    %c0_10 = arith.constant 0 : index
    %c0_11 = arith.constant 0 : index
    %13 = vector.load %arg7[%c0_10, %c0_11] : memref<1x128xf32, #tpu.memory_space<vmem>>, vector<1x128xf32>
    %14 = vector.broadcast %13 : vector<1x128xf32> to vector<8x128xf32>
    %15 = arith.addf %12, %14 : vector<8x128xf32>
    %c0_12 = arith.constant 0 : index
    %c0_13 = arith.constant 0 : index
    %16 = vector.load %arg1[%c0_12, %c0_13] : memref<8x128xbf16, #tpu.memory_space<vmem>>, vector<8x128xbf16>
    %17 = arith.extf %16 : vector<8x128xbf16> to vector<8x128xf32>
    %18 = arith.mulf %1, %15 : vector<8x128xf32>
    %19 = arith.addf %17, %18 : vector<8x128xf32>
    %20 = arith.truncf %19 : vector<8x128xf32> to vector<8x128xbf16>
    %c0_14 = arith.constant 0 : index
    %c0_15 = arith.constant 0 : index
    %21 = vector.load %arg8[%c0_14, %c0_15] : memref<128x128xbf16, #tpu.memory_space<vmem>>, vector<128x128xbf16>
    %cst_16 = arith.constant dense<0.000000e+00> : vector<8x128xf32>
    %22 = tpu.matmul %20, %21, %cst_16 {dimension_numbers = #tpu.dot_dimension_numbers<[1], [0], [0], [1], [0, 0, 1, 1], [], []>} : vector<8x128xbf16>, vector<128x128xbf16>, vector<8x128xf32> -> vector<8x128xf32>
    %c0_17 = arith.constant 0 : index
    %c0_18 = arith.constant 0 : index
    %23 = vector.load %arg9[%c0_17, %c0_18] : memref<1x128xf32, #tpu.memory_space<vmem>>, vector<1x128xf32>
    %24 = vector.broadcast %23 : vector<1x128xf32> to vector<8x128xf32>
    %25 = arith.addf %22, %24 : vector<8x128xf32>
    %c0_19 = arith.constant 0 : index
    %c0_20 = arith.constant 0 : index
    %26 = vector.load %arg10[%c0_19, %c0_20] : memref<8x128xf32, #tpu.memory_space<vmem>>, vector<8x128xf32>
    tpu.vector_store %arg10[%c0_19, %c0_20], %25 {strides = array<i32>} : memref<8x128xf32, #tpu.memory_space<vmem>>, vector<8x128xf32>,
    return
  }
  func.func @transform_0(%arg0: i32) -> (i32, i32) {
    %c0_i32 = arith.constant 0 : i32
    %c0_i32_0 = arith.constant 0 : i32
    return %arg0, %c0_i32 : i32, i32
  }
  func.func @transform_1(%arg0: i32) -> (i32, i32) {
    %c0_i32 = arith.constant 0 : i32
    %c0_i32_0 = arith.constant 0 : i32
    return %arg0, %c0_i32 : i32, i32
  }
  func.func @transform_2(%arg0: i32) -> (i32, i32) {
    %c0_i32 = arith.constant 0 : i32
    %c0_i32_0 = arith.constant 0 : i32
    return %arg0, %c0_i32 : i32, i32
  }
  func.func @transform_3(%arg0: i32) -> (i32, i32) {
    %c0_i32 = arith.constant 0 : i32
    %c0_i32_0 = arith.constant 0 : i32
    %c0_i32_1 = arith.constant 0 : i32
    return %c0_i32, %c0_i32_0 : i32, i32
  }
  func.func @transform_4(%arg0: i32) -> (i32, i32) {
    %c0_i32 = arith.constant 0 : i32
    %c0_i32_0 = arith.constant 0 : i32
    %c0_i32_1 = arith.constant 0 : i32
    return %c0_i32, %c0_i32_0 : i32, i32
  }
  func.func @transform_5(%arg0: i32) -> (i32, i32) {
    %c0_i32 = arith.constant 0 : i32
    %c0_i32_0 = arith.constant 0 : i32
    %c0_i32_1 = arith.constant 0 : i32
    return %c0_i32, %c0_i32_0 : i32, i32
  }
  func.func @transform_6(%arg0: i32) -> (i32, i32) {
    %c0_i32 = arith.constant 0 : i32
    %c0_i32_0 = arith.constant 0 : i32
    %c0_i32_1 = arith.constant 0 : i32
    return %c0_i32, %c0_i32_0 : i32, i32
  }
  func.func @transform_7(%arg0: i32) -> (i32, i32) {
    %c0_i32 = arith.constant 0 : i32
    %c0_i32_0 = arith.constant 0 : i32
    %c0_i32_1 = arith.constant 0 : i32
    return %c0_i32, %c0_i32_0 : i32, i32
  }
  func.func @transform_8(%arg0: i32) -> (i32, i32) {
    %c0_i32 = arith.constant 0 : i32
    %c0_i32_0 = arith.constant 0 : i32
    %c0_i32_1 = arith.constant 0 : i32
    return %c0_i32, %c0_i32_0 : i32, i32
  }
  func.func @transform_9(%arg0: i32) -> (i32, i32) {
    %c0_i32 = arith.constant 0 : i32
    %c0_i32_0 = arith.constant 0 : i32
    return %arg0, %c0_i32 : i32, i32
  }
}

</mosaic_0001>

<bundles_post_ra>
// kernel: decoder_intent.1
= control target key start
LH: loop header
LB: loop body
LE: loop exit
PB: predicated region body
PF: predicated region fallthrough
CT: control target
= control target key end

     0   :  { %14 = vsyncpa [#allocation3], 0  ;;  %s774_s0 = inlined_call_operand.vmem [shape: bf16[8,128], index: 0, kind: input, shape index: {}]   ;;  %s775_s1 = inlined_call_operand.vmem [shape: bf16[8,128], index: 1, kind: input, shape index: {}]   ;;  %s776_s2 = inlined_call_operand.vmem [shape: bf16[8,128], index: 2, kind: input, shape index: {}]   ;;  %s777_s3 = inlined_call_operand.vmem [shape: bf16[128,128], index: 3, kind: input, shape index: {}]   ;;  %s778_s4 = inlined_call_operand.vmem [shape: f32[1,128], index: 4, kind: input, shape index: {}]   ;;  %s779_s5 = inlined_call_operand.hbm [shape: bf16[128,128], index: 5, kind: input, shape index: {}]   ;;  %s780_s6 = inlined_call_operand.vmem [shape: f32[1,128], index: 6, kind: input, shape index: {}]   ;;  %s781_s7 = inlined_call_operand.hbm [shape: bf16[128,128], index: 7, kind: input, shape index: {}]   ;;  %s782_s8 = inlined_call_operand.vmem [shape: f32[1,128], index: 8, kind: input, shape index: {}]   ;;  %s783_s9 = inlined_call_operand.hbm [shape: f32[8,128], index: 9, kind: output, shape index: {}]  }
   0x1   :  { %15 = vsyncpa [#allocation6], 0 }
   0x2   :  { %16 = vsyncpa [#allocation4], 0  ;;  %s636_s30 = smov [#allocation2]  }
   0x3   :  { %s32_s10 = sshll.u32 %s636_s30, 4  ;;  %s33_s10 = int_to_ptr.vmem [resolvable:$true] %s32_s10 }
   0x4   :  { %s578_s11 = scalar_lea.vmem %s33_s10, 1024  ;;  %p583_p1 = scmp.lt.s32.totalorder %s33_s10, %s33_s10 }
   0x5   :  { %p579_p0 = scmp.ne.s32.totalorder %s33_s10, %s578_s11  ;;  %p584_p2 = scmp.lt.s32.totalorder %s578_s11, %s578_s11 }
   0x7   :  { %p585_p3 = por %p584_p2, %p583_p1 }
   0x9   :  { %p586_p4 = pnand %p585_p3, %p579_p0 }
   0xb   :  { %589 = shalt.err (!%p586_p4)
}
   0xc   :  { %s637_s12 = smov 64   ;;  %s638_s13 = smov 4  }
   0xd   :  { %38 = dma.hbm_to_vmem [thread:$0]  %s779_s5, 1024, %s33_s10, [#allocation3], %s637_s12, %s637_s12, %s638_s13  }
   0xe   :  { %s639_s16 = smov [#allocation5]  }
   0xf   :  { %s46_s17 = sshll.u32 %s639_s16, 4  ;;  %s47_s17 = int_to_ptr.vmem [resolvable:$true] %s46_s17 }
  0x10   :  { %s598_s18 = scalar_lea.vmem %s47_s17, 1024  ;;  %p603_p6 = scmp.lt.s32.totalorder %s47_s17, %s47_s17 }
  0x11   :  { %p599_p5 = scmp.ne.s32.totalorder %s47_s17, %s598_s18  ;;  %p604_p7 = scmp.lt.s32.totalorder %s598_s18, %s598_s18 }
  0x13   :  { %p605_p8 = por %p604_p7, %p603_p6 }
  0x15   :  { %p606_p9 = pnand %p605_p8, %p599_p5 }
  0x17   :  { %609 = shalt.err (!%p606_p9)
}
  0x18   :  { %52 = dma.hbm_to_vmem [thread:$0]  %s781_s7, 1024, %s47_s17, [#allocation6], %s637_s12, %s637_s12, %s638_s13  }
  0x19   :  { %630 = dma.done.wait [#allocation3], 1024  }
  0x1a   :  { %631 = vsyncadd [#allocation3], 4294966272 }
  0x1b   :  { %632 = dma.done.wait [#allocation6], 1024  }
  0x1c   :  { %633 = vsyncadd [#allocation6], 4294966272  ;;  %v640_v0 = vmov 0.0   ;;  %vm641_vm0 = vmmov 0   ;;  %v544_v1 = vld [vmem:[%s777_s3 + $0x38] sm:$0xff]   ;;  %v545_v2 = vld [vmem:[%s777_s3 + $0x30] sm:$0xff]  }
  0x1d   :  { %477 = vmatprep.subr.bf16.mxu0 %v640_v0  ;;  %493 = vmatprep.mubr.msk.bf16.mxu0 %vm641_vm0, %v640_v0  ;;  %v546_v3 = vld [vmem:[%s777_s3 + $0x28] sm:$0xff]   ;;  %v552_v4 = vld [vmem:[#allocation2 + $0x38] sm:$0xff]   ;;  %v547_v5 = vld [vmem:[%s777_s3 + $0x20] sm:$0xff]   ;;  %s642_s21 = smov [#allocation7]  }
  0x1e   :  { %497 = vmatprep.subr.bf16.mxu1 %v640_v0  ;;  %513 = vmatprep.mubr.msk.bf16.mxu1 %vm641_vm0, %v640_v0  ;;  %v553_v6 = vld [vmem:[#allocation2 + $0x30] sm:$0xff]   ;;  %v548_v7 = vld [vmem:[%s777_s3 + $0x18] sm:$0xff]   ;;  %v554_v8 = vld [vmem:[#allocation2 + $0x28] sm:$0xff]  }
  0x1f   :  { %478 = vmatpush3.bf16.msra.mxu0 %v544_v1  ;;  %498 = vmatpush3.bf16.msra.mxu1 %v552_v4  ;;  %v549_v9 = vld [vmem:[%s777_s3 + $0x10] sm:$0xff]   ;;  %v550_v10 = vld [vmem:[%s777_s3 + $0x8] sm:$0xff]   ;;  %v551_v11 = vld [vmem:[%s777_s3] sm:$0xff]  }
  0x20   :  { %479 = vmatprep.subr.bf16.mxu0 %v640_v0  ;;  %499 = vmatprep.subr.bf16.mxu1 %v640_v0  ;;  %v64_v12 = vld [vmem:[%s776_s2] sm:$0xf]  ;;  %v556_v14 = vld [vmem:[#allocation2 + $0x18] sm:$0xff]   ;;  %v557_v15 = vld [vmem:[#allocation2 + $0x10] sm:$0xff]  }
  0x21   :  { %v555_v13 = vld [vmem:[#allocation2 + $0x20] sm:$0xff]   ;;  %v558_v16 = vld [vmem:[#allocation2 + $0x8] sm:$0xff]   ;;  %v560_v18 = vld [vmem:[#allocation5 + $0x38] sm:$0xff]  }
  0x22   :  { %v559_v17 = vld [vmem:[#allocation2] sm:$0xff]   ;;  %v561_v19 = vld [vmem:[#allocation5 + $0x30] sm:$0xff]   ;;  %v562_v20 = vld [vmem:[#allocation5 + $0x28] sm:$0xff]  }
  0x23   :  { %480 = vmatpush3.bf16.msra.mxu0 %v545_v2  ;;  %500 = vmatpush3.bf16.msra.mxu1 %v553_v6  ;;  %v563_v21 = vld [vmem:[#allocation5 + $0x20] sm:$0xff]   ;;  %v564_v22 = vld [vmem:[#allocation5 + $0x18] sm:$0xff]   ;;  %v565_v23 = vld [vmem:[#allocation5 + $0x10] sm:$0xff]  }
  0x24   :  { %481 = vmatprep.subr.bf16.mxu0 %v640_v0  ;;  %501 = vmatprep.subr.bf16.mxu1 %v640_v0  ;;  %v62_v24 = vld [vmem:[%s775_s1] sm:$0xf]  ;;  %v566_v35 = vld [vmem:[#allocation5 + $0x8] sm:$0xff]  }
  0x25   :  { %v423_v25 = vld [vmem:[%s778_s4] ss:$0 sm:$0xff]  ;;  %v63_v26 = vunpack.c.l.bf16 %v62_v24 }
  0x26   :  { %v567_v36 = vld [vmem:[#allocation5] sm:$0xff]  }
  0x27   :  { %482 = vmatpush3.bf16.msra.mxu0 %v546_v3  ;;  %502 = vmatpush3.bf16.msra.mxu1 %v554_v8  ;;  %v432_v37 = vld [vmem:[%s780_s6] ss:$0 sm:$0xff]  ;;  %s413_s6 = sshll.u32 %s642_s21, 4  ;;  %s414_s6 = int_to_ptr.vmem [resolvable:$true] %s413_s6 }
  0x28   :  { %483 = vmatprep.subr.bf16.mxu0 %v640_v0  ;;  %503 = vmatprep.subr.bf16.mxu1 %v640_v0  ;;  %v290_v38 = vld [vmem:[%s774_s0] sm:$0xf]  ;;  %s610_s0 = scalar_lea.vmem %s414_s6, 128  ;;  %p615_p11 = scmp.lt.s32.totalorder %s414_s6, %s414_s6 }
  0x29   :  { %v291_v41 = vunpack.c.l.bf16 %v290_v38  ;;  %v441_v48 = vld [vmem:[%s782_s8] ss:$0 sm:$0xff]  ;;  %p611_p10 = scmp.ne.s32.totalorder %s414_s6, %s610_s0  ;;  %p616_p12 = scmp.lt.s32.totalorder %s610_s0, %s610_s0 }
  0x2b   :  { %484 = vmatpush3.bf16.msra.mxu0 %v547_v5  ;;  %504 = vmatpush3.bf16.msra.mxu1 %v555_v13  ;;  %p617_p13 = por %p616_p12, %p615_p11 }
  0x2c   :  { %485 = vmatprep.subr.bf16.mxu0 %v640_v0  ;;  %505 = vmatprep.subr.bf16.mxu1 %v640_v0 }
  0x2d   :  { %p618_p0 = pnand %p617_p13, %p611_p10 }
  0x2f   :  { %486 = vmatpush3.bf16.msra.mxu0 %v548_v7  ;;  %506 = vmatpush3.bf16.msra.mxu1 %v556_v14 }
  0x30   :  { %487 = vmatprep.subr.bf16.mxu0 %v640_v0  ;;  %507 = vmatprep.subr.bf16.mxu1 %v640_v0 }
  0x33   :  { %488 = vmatpush3.bf16.msra.mxu0 %v549_v9  ;;  %508 = vmatpush3.bf16.msra.mxu1 %v557_v15 }
  0x34   :  { %489 = vmatprep.subr.bf16.mxu0 %v640_v0  ;;  %509 = vmatprep.subr.bf16.mxu1 %v640_v0 }
  0x37   :  { %490 = vmatpush3.bf16.msra.mxu0 %v550_v10  ;;  %510 = vmatpush3.bf16.msra.mxu1 %v558_v16 }
  0x38   :  { %491 = vmatprep.subr.bf16.mxu0 %v640_v0  ;;  %511 = vmatprep.subr.bf16.mxu1 %v640_v0 }
  0x3b   :  { %492 = vmatpush3.bf16.msra.mxu0 %v551_v11  ;;  %512 = vmatpush3.bf16.msra.mxu1 %v559_v17 }
  0x3c   :  { %517 = vmatprep.subr.bf16.mxu0 %v640_v0 }
  0x3e   :  { %494 = vmatmul.mubr.bf16.vlgmr.msra.gmra.mxu0 %v64_v12 }
  0x3f   :  { %533 = vmatprep.mubr.msk.bf16.mxu0 %vm641_vm0, %v640_v0  ;;  %518 = vmatpush3.bf16.msra.mxu0 %v560_v18 }
  0x40   :  { %519 = vmatprep.subr.bf16.mxu0 %v640_v0 }
  0x43   :  { %520 = vmatpush3.bf16.msra.mxu0 %v561_v19 }
  0x44   :  { %521 = vmatprep.subr.bf16.mxu0 %v640_v0 }
  0x47   :  { %522 = vmatpush3.bf16.msra.mxu0 %v562_v20 }
  0x48   :  { %523 = vmatprep.subr.bf16.mxu0 %v640_v0 }
  0x4b   :  { %524 = vmatpush3.bf16.msra.mxu0 %v563_v21 }
  0x4c   :  { %525 = vmatprep.subr.bf16.mxu0 %v640_v0 }
  0x4f   :  { %526 = vmatpush3.bf16.msra.mxu0 %v564_v22 }
  0x50   :  { %527 = vmatprep.subr.bf16.mxu0 %v640_v0 }
  0x53   :  { %528 = vmatpush3.bf16.msra.mxu0 %v565_v23 }
  0x54   :  { %529 = vmatprep.subr.bf16.mxu0 %v640_v0 }
  0x57   :  { %530 = vmatpush3.bf16.msra.mxu0 %v566_v35 }
  0x58   :  { %531 = vmatprep.subr.bf16.mxu0 %v640_v0 }
  0x5b   :  { %532 = vmatpush3.bf16.msra.mxu0 %v567_v36 }
  0xfe   :  { %v170_v27 = vpop.f32.mrf.mxu0 }
  0xff   :  { %v171_v28 = vadd.f32 %v423_v25, %v170_v27 }
 0x100   :  { %v495_v29 = vpop.f32.mrf.mxu0 }
 0x101   :  { %v176_v30 = vadd.f32 %v171_v28, %v63_v26 }
 0x102   :  { %v173_v31 = vpop.f32.mrf.mxu0 }
 0x103   :  { %v177_v32 = vpack.c.bf16 %v176_v30, %v176_v30 }
 0x104   :  { %v496_v33 = vpop.f32.mrf.mxu0 }
 0x105   :  { %568 = vtanh.bf16 %v177_v32 }
 0x113   :  { %v569_v34 = vpop.eup %568 }
 0x114   :  { %514 = vmatmul.mubr.bf16.vlgmr.msra.gmra.mxu1 %v569_v34 }
 0x1d4   :  { %v284_v39 = vpop.f32.mrf.mxu1 }
 0x1d5   :  { %v285_v40 = vadd.f32 %v432_v37, %v284_v39 }
 0x1d6   :  { %v515_v42 = vpop.f32.mrf.mxu1 }
 0x1d7   :  { %v292_v43 = vmul.f32 %v285_v40, %v63_v26 }
 0x1d8   :  { %v287_v44 = vpop.f32.mrf.mxu1 }
 0x1d9   :  { %v293_v45 = vadd.f32 %v292_v43, %v291_v41 }
 0x1da   :  { %v516_v46 = vpop.f32.mrf.mxu1 }
 0x1db   :  { %v294_v47 = vpack.c.bf16 %v293_v45, %v293_v45 }
 0x1dd   :  { %534 = vmatmul.mubr.bf16.vlgmr.msra.gmra.mxu0 %v294_v47 }
 0x29d   :  { %v400_v49 = vpop.f32.mrf.mxu0 }
 0x29e   :  { %v401_v50 = vadd.f32 %v441_v48, %v400_v49 }
 0x29f   :  { %v535_v51 = vpop.f32.mrf.mxu0 }
 0x2a0   :  { %406 = vst [vmem:[#allocation7] sm:$0xff] %v401_v50 }
 0x2a1   :  { %v403_v52 = vpop.f32.mrf.mxu0 }
 0x2a2   :  { %621 = shalt.err (!%p618_p0)
}
 0x2a3   :  { %416 = dma.vmem_to_hbm [thread:$0]  %s414_s6, 128, %s783_s9, [#allocation4]   ;;  %v536_v53 = vpop.f32.mrf.mxu0 }
 0x2a4   :  { %634 = dma.done.wait [#allocation4], 128  }
 0x2a5   :  { %635 = vsyncadd [#allocation4], 4294967168 }
 0x2a6   :  { %420 = vsyncpa [#allocation3], 1 }
 0x2a7   :  { %421 = vsyncpa [#allocation6], 1 }
 0x2a8   :  { %422 = vsyncpa [#allocation4], 1 }

// kernel: decoder_intent.1
= control target key start
LH: loop header
LB: loop body
LE: loop exit
PB: predicated region body
PF: predicated region fallthrough
CT: control target
= control target key end

     0   :  { %14 = vsyncpa [#allocation3], 0  ;;  %s774_s0 = inlined_call_operand.vmem [shape: bf16[8,128], index: 0, kind: input, shape index: {}]   ;;  %s775_s1 = inlined_call_operand.vmem [shape: bf16[8,128], index: 1, kind: input, shape index: {}]   ;;  %s776_s2 = inlined_call_operand.vmem [shape: bf16[8,128], index: 2, kind: input, shape index: {}]   ;;  %s777_s3 = inlined_call_operand.vmem [shape: bf16[128,128], index: 3, kind: input, shape index: {}]   ;;  %s778_s4 = inlined_call_operand.vmem [shape: f32[1,128], index: 4, kind: input, shape index: {}]   ;;  %s779_s5 = inlined_call_operand.hbm [shape: bf16[128,128], index: 5, kind: input, shape index: {}]   ;;  %s780_s6 = inlined_call_operand.vmem [shape: f32[1,128], index: 6, kind: input, shape index: {}]   ;;  %s781_s7 = inlined_call_operand.hbm [shape: bf16[128,128], index: 7, kind: input, shape index: {}]   ;;  %s782_s8 = inlined_call_operand.vmem [shape: f32[1,128], index: 8, kind: input, shape index: {}]   ;;  %s783_s9 = inlined_call_operand.hbm [shape: f32[8,128], index: 9, kind: output, shape index: {}]  }
   0x1   :  { %15 = vsyncpa [#allocation6], 0 }
   0x2   :  { %16 = vsyncpa [#allocation4], 0  ;;  %s636_s30 = smov [#allocation2]  }
   0x3   :  { %s32_s10 = sshll.u32 %s636_s30, 4  ;;  %s33_s10 = int_to_ptr.vmem [resolvable:$true] %s32_s10 }
   0x4   :  { %s578_s11 = scalar_lea.vmem %s33_s10, 1024  ;;  %p583_p1 = scmp.lt.s32.totalorder %s33_s10, %s33_s10 }
   0x5   :  { %p579_p0 = scmp.ne.s32.totalorder %s33_s10, %s578_s11  ;;  %p584_p2 = scmp.lt.s32.totalorder %s578_s11, %s578_s11 }
   0x7   :  { %p585_p3 = por %p584_p2, %p583_p1 }
   0x9   :  { %p586_p4 = pnand %p585_p3, %p579_p0 }
   0xb   :  { %589 = shalt.err (!%p586_p4)
}
   0xc   :  { %s637_s12 = smov 64   ;;  %s638_s13 = smov 4  }
   0xd   :  { %38 = dma.hbm_to_vmem [thread:$0]  %s779_s5, 1024, %s33_s10, [#allocation3], %s637_s12, %s637_s12, %s638_s13  }
   0xe   :  { %s639_s16 = smov [#allocation5]  }
   0xf   :  { %s46_s17 = sshll.u32 %s639_s16, 4  ;;  %s47_s17 = int_to_ptr.vmem [resolvable:$true] %s46_s17 }
  0x10   :  { %s598_s18 = scalar_lea.vmem %s47_s17, 1024  ;;  %p603_p6 = scmp.lt.s32.totalorder %s47_s17, %s47_s17 }
  0x11   :  { %p599_p5 = scmp.ne.s32.totalorder %s47_s17, %s598_s18  ;;  %p604_p7 = scmp.lt.s32.totalorder %s598_s18, %s598_s18 }
  0x13   :  { %p605_p8 = por %p604_p7, %p603_p6 }
  0x15   :  { %p606_p9 = pnand %p605_p8, %p599_p5 }
  0x17   :  { %609 = shalt.err (!%p606_p9)
}
  0x18   :  { %52 = dma.hbm_to_vmem [thread:$0]  %s781_s7, 1024, %s47_s17, [#allocation6], %s637_s12, %s637_s12, %s638_s13  }
  0x19   :  { %630 = dma.done.wait [#allocation3], 1024  }
  0x1a   :  { %631 = vsyncadd [#allocation3], 4294966272 }
  0x1b   :  { %632 = dma.done.wait [#allocation6], 1024  }
  0x1c   :  { %633 = vsyncadd [#allocation6], 4294966272  ;;  %v640_v0 = vmov 0.0   ;;  %vm641_vm0 = vmmov 0   ;;  %v544_v1 = vld [vmem:[%s777_s3 + $0x38] sm:$0xff]   ;;  %v545_v2 = vld [vmem:[%s777_s3 + $0x30] sm:$0xff]  }
  0x1d   :  { %477 = vmatprep.subr.bf16.mxu0 %v640_v0  ;;  %493 = vmatprep.mubr.msk.bf16.mxu0 %vm641_vm0, %v640_v0  ;;  %v546_v3 = vld [vmem:[%s777_s3 + $0x28] sm:$0xff]   ;;  %v552_v4 = vld [vmem:[#allocation2 + $0x38] sm:$0xff]   ;;  %v547_v5 = vld [vmem:[%s777_s3 + $0x20] sm:$0xff]   ;;  %s642_s21 = smov [#allocation7]  }
  0x1e   :  { %497 = vmatprep.subr.bf16.mxu1 %v640_v0  ;;  %513 = vmatprep.mubr.msk.bf16.mxu1 %vm641_vm0, %v640_v0  ;;  %v553_v6 = vld [vmem:[#allocation2 + $0x30] sm:$0xff]   ;;  %v548_v7 = vld [vmem:[%s777_s3 + $0x18] sm:$0xff]   ;;  %v554_v8 = vld [vmem:[#allocation2 + $0x28] sm:$0xff]  }
  0x1f   :  { %478 = vmatpush3.bf16.msra.mxu0 %v544_v1  ;;  %498 = vmatpush3.bf16.msra.mxu1 %v552_v4  ;;  %v549_v9 = vld [vmem:[%s777_s3 + $0x10] sm:$0xff]   ;;  %v550_v10 = vld [vmem:[%s777_s3 + $0x8] sm:$0xff]   ;;  %v551_v11 = vld [vmem:[%s777_s3] sm:$0xff]  }
  0x20   :  { %479 = vmatprep.subr.bf16.mxu0 %v640_v0  ;;  %499 = vmatprep.subr.bf16.mxu1 %v640_v0  ;;  %v64_v12 = vld [vmem:[%s776_s2] sm:$0xf]  ;;  %v556_v14 = vld [vmem:[#allocation2 + $0x18] sm:$0xff]   ;;  %v557_v15 = vld [vmem:[#allocation2 + $0x10] sm:$0xff]  }
  0x21   :  { %v555_v13 = vld [vmem:[#allocation2 + $0x20] sm:$0xff]   ;;  %v558_v16 = vld [vmem:[#allocation2 + $0x8] sm:$0xff]   ;;  %v560_v18 = vld [vmem:[#allocation5 + $0x38] sm:$0xff]  }
  0x22   :  { %v559_v17 = vld [vmem:[#allocation2] sm:$0xff]   ;;  %v561_v19 = vld [vmem:[#allocation5 + $0x30] sm:$0xff]   ;;  %v562_v20 = vld [vmem:[#allocation5 + $0x28] sm:$0xff]  }
  0x23   :  { %480 = vmatpush3.bf16.msra.mxu0 %v545_v2  ;;  %500 = vmatpush3.bf16.msra.mxu1 %v553_v6  ;;  %v563_v21 = vld [vmem:[#allocation5 + $0x20] sm:$0xff]   ;;  %v564_v22 = vld [vmem:[#allocation5 + $0x18] sm:$0xff]   ;;  %v565_v23 = vld [vmem:[#allocation5 + $0x10] sm:$0xff]  }
  0x24   :  { %481 = vmatprep.subr.bf16.mxu0 %v640_v0  ;;  %501 = vmatprep.subr.bf16.mxu1 %v640_v0  ;;  %v62_v24 = vld [vmem:[%s775_s1] sm:$0xf]  ;;  %v566_v35 = vld [vmem:[#allocation5 + $0x8] sm:$0xff]  }
  0x25   :  { %v423_v25 = vld [vmem:[%s778_s4] ss:$0 sm:$0xff]  ;;  %v63_v26 = vunpack.c.l.bf16 %v62_v24 }
  0x26   :  { %v567_v36 = vld [vmem:[#allocation5] sm:$0xff]  }
  0x27   :  { %482 = vmatpush3.bf16.msra.mxu0 %v546_v3  ;;  %502 = vmatpush3.bf16.msra.mxu1 %v554_v8  ;;  %v432_v37 = vld [vmem:[%s780_s6] ss:$0 sm:$0xff]  ;;  %s413_s6 = sshll.u32 %s642_s21, 4  ;;  %s414_s6 = int_to_ptr.vmem [resolvable:$true] %s413_s6 }
  0x28   :  { %483 = vmatprep.subr.bf16.mxu0 %v640_v0  ;;  %503 = vmatprep.subr.bf16.mxu1 %v640_v0  ;;  %v290_v38 = vld [vmem:[%s774_s0] sm:$0xf]  ;;  %s610_s0 = scalar_lea.vmem %s414_s6, 128  ;;  %p615_p11 = scmp.lt.s32.totalorder %s414_s6, %s414_s6 }
  0x29   :  { %v291_v41 = vunpack.c.l.bf16 %v290_v38  ;;  %v441_v48 = vld [vmem:[%s782_s8] ss:$0 sm:$0xff]  ;;  %p611_p10 = scmp.ne.s32.totalorder %s414_s6, %s610_s0  ;;  %p616_p12 = scmp.lt.s32.totalorder %s610_s0, %s610_s0 }
  0x2b   :  { %484 = vmatpush3.bf16.msra.mxu0 %v547_v5  ;;  %504 = vmatpush3.bf16.msra.mxu1 %v555_v13  ;;  %p617_p13 = por %p616_p12, %p615_p11 }
  0x2c   :  { %485 = vmatprep.subr.bf16.mxu0 %v640_v0  ;;  %505 = vmatprep.subr.bf16.mxu1 %v640_v0 }
  0x2d   :  { %p618_p0 = pnand %p617_p13, %p611_p10 }
  0x2f   :  { %486 = vmatpush3.bf16.msra.mxu0 %v548_v7  ;;  %506 = vmatpush3.bf16.msra.mxu1 %v556_v14 }
  0x30   :  { %487 = vmatprep.subr.bf16.mxu0 %v640_v0  ;;  %507 = vmatprep.subr.bf16.mxu1 %v640_v0 }
  0x33   :  { %488 = vmatpush3.bf16.msra.mxu0 %v549_v9  ;;  %508 = vmatpush3.bf16.msra.mxu1 %v557_v15 }
  0x34   :  { %489 = vmatprep.subr.bf16.mxu0 %v640_v0  ;;  %509 = vmatprep.subr.bf16.mxu1 %v640_v0 }
  0x37   :  { %490 = vmatpush3.bf16.msra.mxu0 %v550_v10  ;;  %510 = vmatpush3.bf16.msra.mxu1 %v558_v16 }
  0x38   :  { %491 = vmatprep.subr.bf16.mxu0 %v640_v0  ;;  %511 = vmatprep.subr.bf16.mxu1 %v640_v0 }
  0x3b   :  { %492 = vmatpush3.bf16.msra.mxu0 %v551_v11  ;;  %512 = vmatpush3.bf16.msra.mxu1 %v559_v17 }
  0x3c   :  { %517 = vmatprep.subr.bf16.mxu0 %v640_v0 }
  0x3e   :  { %494 = vmatmul.mubr.bf16.vlgmr.msra.gmra.mxu0 %v64_v12 }
  0x3f   :  { %533 = vmatprep.mubr.msk.bf16.mxu0 %vm641_vm0, %v640_v0  ;;  %518 = vmatpush3.bf16.msra.mxu0 %v560_v18 }
  0x40   :  { %519 = vmatprep.subr.bf16.mxu0 %v640_v0 }
  0x43   :  { %520 = vmatpush3.bf16.msra.mxu0 %v561_v19 }
  0x44   :  { %521 = vmatprep.subr.bf16.mxu0 %v640_v0 }
  0x47   :  { %522 = vmatpush3.bf16.msra.mxu0 %v562_v20 }
  0x48   :  { %523 = vmatprep.subr.bf16.mxu0 %v640_v0 }
  0x4b   :  { %524 = vmatpush3.bf16.msra.mxu0 %v563_v21 }
  0x4c   :  { %525 = vmatprep.subr.bf16.mxu0 %v640_v0 }
  0x4f   :  { %526 = vmatpush3.bf16.msra.mxu0 %v564_v22 }
  0x50   :  { %527 = vmatprep.subr.bf16.mxu0 %v640_v0 }
  0x53   :  { %528 = vmatpush3.bf16.msra.mxu0 %v565_v23 }
  0x54   :  { %529 = vmatprep.subr.bf16.mxu0 %v640_v0 }
  0x57   :  { %530 = vmatpush3.bf16.msra.mxu0 %v566_v35 }
  0x58   :  { %531 = vmatprep.subr.bf16.mxu0 %v640_v0 }
  0x5b   :  { %532 = vmatpush3.bf16.msra.mxu0 %v567_v36 }
  0xfe   :  { %v170_v27 = vpop.f32.mrf.mxu0 }
  0xff   :  { %v171_v28 = vadd.f32 %v423_v25, %v170_v27 }
 0x100   :  { %v495_v29 = vpop.f32.mrf.mxu0 }
 0x101   :  { %v176_v30 = vadd.f32 %v171_v28, %v63_v26 }
 0x102   :  { %v173_v31 = vpop.f32.mrf.mxu0 }
 0x103   :  { %v177_v32 = vpack.c.bf16 %v176_v30, %v176_v30 }
 0x104   :  { %v496_v33 = vpop.f32.mrf.mxu0 }
 0x105   :  { %568 = vtanh.bf16 %v177_v32 }
 0x113   :  { %v569_v34 = vpop.eup %568 }
 0x114   :  { %514 = vmatmul.mubr.bf16.vlgmr.msra.gmra.mxu1 %v569_v34 }
 0x1d4   :  { %v284_v39 = vpop.f32.mrf.mxu1 }
 0x1d5   :  { %v285_v40 = vadd.f32 %v432_v37, %v284_v39 }
 0x1d6   :  { %v515_v42 = vpop.f32.mrf.mxu1 }
 0x1d7   :  { %v292_v43 = vmul.f32 %v285_v40, %v63_v26 }
 0x1d8   :  { %v287_v44 = vpop.f32.mrf.mxu1 }
 0x1d9   :  { %v293_v45 = vadd.f32 %v292_v43, %v291_v41 }
 0x1da   :  { %v516_v46 = vpop.f32.mrf.mxu1 }
 0x1db   :  { %v294_v47 = vpack.c.bf16 %v293_v45, %v293_v45 }
 0x1dd   :  { %534 = vmatmul.mubr.bf16.vlgmr.msra.gmra.mxu0 %v294_v47 }
 0x29d   :  { %v400_v49 = vpop.f32.mrf.mxu0 }
 0x29e   :  { %v401_v50 = vadd.f32 %v441_v48, %v400_v49 }
 0x29f   :  { %v535_v51 = vpop.f32.mrf.mxu0 }
 0x2a0   :  { %406 = vst [vmem:[#allocation7] sm:$0xff] %v401_v50 }
 0x2a1   :  { %v403_v52 = vpop.f32.mrf.mxu0 }
 0x2a2   :  { %621 = shalt.err (!%p618_p0)
}
 0x2a3   :  { %416 = dma.vmem_to_hbm [thread:$0]  %s414_s6, 128, %s783_s9, [#allocation4]   ;;  %v536_v53 = vpop.f32.mrf.mxu0 }
 0x2a4   :  { %634 = dma.done.wait [#allocation4], 128  }
 0x2a5   :  { %635 = vsyncadd [#allocation4], 4294967168 }
 0x2a6   :  { %420 = vsyncpa [#allocation3], 1 }
 0x2a7   :  { %421 = vsyncpa [#allocation6], 1 }
 0x2a8   :  { %422 = vsyncpa [#allocation4], 1 }

</bundles_post_ra>
